<compile_context>
chip_gen: v5e
topology: v5e:2x2
jax: 0.10.0
libtpu: 0.0.40
codegen_flags: <defaults>
</compile_context>

<pallas_src>
import functools

import jax
import jax.numpy as jnp
from jax import lax
from jax.experimental import pallas as pl
from jax.experimental.pallas import tpu as pltpu

# Per-input-block budget.  Worst case VMEM: 2 x ~6.3 MiB input double-buffer +
# 2 x 0.5 MiB output accumulator block < 14 MiB -> safe on v5e (16 MiB scoped
# default), v6e (32 MiB default / 128 MiB physical) and v7x (32 MiB / 64 MiB).
_MAX_BLOCK_BYTES = 6 * 1024 * 1024
# Cap on the spatial (lane) tile so the resident f32 accumulator stays small.
_MAX_LANE_TILE = 16 * 1024           # multiple of 128
# Spatial extents at or below this stay a single full-extent lane block.
_SPATIAL_SPLIT_MIN = 4096


def _round_up(x, m):
    return -(-x // m) * m


def _round_down(x, m):
    return (x // m) * m


def _sum_sigmoid_kernel(feat_ref, out_ref, *, num_channels, tc, acc_rows):
    """Accumulate the channel-sum of sigmoid(features) for one spatial tile.

    feat_ref: [tc, ts] channel tile of one pyramid level (VMEM).
    out_ref : [acc_rows, ts] f32 partial-sum block.  Its block index ignores
              the channel grid axis, so it stays resident in VMEM across the
              whole channel sweep and acts as the accumulator.
    """
    c = pl.program_id(1)

    @pl.when(c == 0)
    def _init():
        out_ref[...] = jnp.zeros_like(out_ref)

    x = feat_ref[...].astype(jnp.float32)     # bf16 stays bf16 in HBM, upcast here
    s = jax.nn.sigmoid(x)                     # EUP transcendental, f32

    if num_channels % tc != 0:
        # Last channel tile reads past C: zero the out-of-bounds rows.
        ch = c * tc + lax.broadcasted_iota(jnp.int32, s.shape, 0)
        s = jnp.where(ch < num_channels, s, 0.0)

    if acc_rows == 8:
        # Fold tc rows into 8 sublanes with pure VPU adds; the single 8 -> 1
        # cross-sublane reduce happens in the tiny JAX epilogue.
        out_ref[...] += s.reshape(tc // 8, 8, s.shape[1]).sum(axis=0)
    else:
        # tc == C with C % 8 != 0  =>  exactly one channel step: one reduce.
        out_ref[...] += jnp.sum(s, axis=0, keepdims=True)


def _level_tiles(C, L, itemsize, block_bytes):
    """Pick (spatial tile, #spatial tiles, channel tile, #channel tiles, acc rows)."""
    budget_elems = max(1, block_bytes // itemsize)          # dtype-aware sizing

    # Spatial (lane) tile: full extent when small (legal even if not a multiple
    # of 128), otherwise multiple-of-128 halves so the "parallel" spatial axis
    # has >= 2 tiles for megacore sharding.  Out-of-bounds lanes of a partial
    # last tile never mix with valid lanes (all ops are lane-elementwise) and
    # are discarded on output write-back.
    if L <= _SPATIAL_SPLIT_MIN:
        ts = L
    else:
        ts = min(_round_up(-(-L // 2), 128), _MAX_LANE_TILE)
    n_s = -(-L // ts)

    # Channel (sublane) tile: multiple of 8, sized to the block budget; use the
    # full channel extent when it fits (no masking, no channel grid).
    max_tc = max(8, _round_down(budget_elems // ts, 8))
    tc = C if C <= max_tc else max_tc
    n_c = -(-C // tc)

    acc_rows = 8 if tc % 8 == 0 else 1
    return ts, n_s, tc, n_c, acc_rows


def _level_heatmap(feat2d, C, L, block_bytes):
    """[C, L] features -> normalized [L] heatmap (sum-of-sigmoids / global max)."""
    itemsize = feat2d.dtype.itemsize
    ts, n_s, tc, n_c, acc_rows = _level_tiles(C, L, itemsize, block_bytes)

    kernel = functools.partial(_sum_sigmoid_kernel,
                               num_channels=C, tc=tc, acc_rows=acc_rows)

    sums = pl.pallas_call(
        kernel,
        out_shape=jax.ShapeDtypeStruct((acc_rows, L), jnp.float32),
        grid_spec=pltpu.PrefetchScalarGridSpec(
            num_scalar_prefetch=0,
            grid=(n_s, n_c),                                   # reduction axis last
            in_specs=[pl.BlockSpec((tc, ts), lambda s, c: (c, s))],
            out_specs=pl.BlockSpec((acc_rows, ts), lambda s, c: (0, s)),
        ),
        compiler_params=pltpu.CompilerParams(
            dimension_semantics=("parallel", "arbitrary")),
    )(feat2d)

    # Tiny epilogue in plain JAX (<= 8 x H*W f32): fold the 8-row accumulator,
    # the (dead-code) ReLU, and the global-max normalization.  The channel MEAN
    # equals SUM / C, and the 1/C cancels in the division by the global max.
    hm = jnp.sum(sums, axis=0)
    hm = jnp.maximum(hm, 0.0)          # no-op: sum of sigmoids is strictly > 0
    return hm / jnp.max(hm)


def heatmap_forward(hooked_outputs, block_bytes=_MAX_BLOCK_BYTES):
    """Mirrors heatmap.forward's loop over hooked retina_cls outputs.

    hooked_outputs: list of [1, C, H, W] feature maps (levels may differ in
    C/H/W).  Returns a list of normalized [H, W] float32 heatmaps.

    # TODO(synk): inference_detector / forward-hook registration has no Pallas
    # equivalent; the hooked outputs are passed in directly.
    # TODO(synk): cv2.resize / applyColorMap / 0.4*heatmap + img / imwrite are
    # image-I/O post-processing with no Pallas equivalent and are omitted.
    """
    results = []
    for p in hooked_outputs:
        p = jnp.asarray(p)
        assert p.ndim == 4 and p.shape[0] == 1, "expected [1, C, H, W]"
        _, C, H, W = p.shape
        feat2d = p.reshape(C, H * W)          # free contiguous reshape, lane-dense
        hm = _level_heatmap(feat2d, C, H * W, block_bytes)
        results.append(hm.reshape(H, W))
    return results


def compute_heatmap(conv_features):
    """Single-map convenience wrapper: [1, C, H, W] -> normalized [H, W] float32."""
    return heatmap_forward([conv_features])[0]


def _reference(conv_features):
    feat = jnp.asarray(conv_features[0], jnp.float32)
    sig = jax.nn.sigmoid(feat)
    hm = jnp.mean(sig, axis=0)
    hm = jnp.maximum(hm, 0.0)
    return hm / jnp.max(hm)


if __name__ == "__main__":
    key = jax.random.PRNGKey(0)
    ks = jax.random.split(key, 5)
    # Simulated retina_cls hooked outputs (batch=1).  Shapes exercise:
    #  - full-extent lane blocks that are NOT multiples of 128 (13*21 = 273),
    #  - a spatial split with a partial last tile (72*72 = 5184 > 4096),
    #  - C % 8 != 0 (4, 20) and C % 8 == 0 (16),
    #  - a bf16-in-HBM level.
    p_out = [
        jax.random.normal(ks[0], (1, 4, 16, 16), dtype=jnp.float32),
        jax.random.normal(ks[1], (1, 4, 8, 128), dtype=jnp.float32),
        jax.random.normal(ks[2], (1, 20, 13, 21), dtype=jnp.float32),
        jax.random.normal(ks[3], (1, 16, 72, 72), dtype=jnp.float32),
        jax.random.normal(ks[4], (1, 4, 16, 16), dtype=jnp.bfloat16),
    ]

    outs = heatmap_forward(p_out)
    outs = [jax.block_until_ready(o) for o in outs]

    # correctness check against a pure-JAX reference
    for o, p in zip(outs, p_out):
        ref = _reference(p)
        assert o.shape == ref.shape and o.dtype == jnp.float32
        assert float(jnp.max(jnp.abs(o - ref))) < 1e-5

    # Also exercise the channel-tiling + out-of-bounds-channel-masking path by
    # forcing a tiny block budget (tc=64 < C=96, C % tc != 0, 8-row accumulator).
    small = jax.random.normal(jax.random.PRNGKey(1), (1, 96, 16, 16), jnp.float32)
    o_small = jax.block_until_ready(
        heatmap_forward([small], block_bytes=64 * 1024)[0])
    assert float(jnp.max(jnp.abs(o_small - _reference(small)))) < 1e-5

    print("KERNEL_OK")
</pallas_src>

<mosaic_0001>
module attributes {stable_mosaic.version = 11 : i64} {
  func.func @_sum_sigmoid_kernel(%arg0: i32, %arg1: i32, %arg2: memref<4x256xf32, #tpu.memory_space<vmem>>, %arg3: memref<1x256xf32, #tpu.memory_space<vmem>>) attributes {dimension_semantics = [#tpu.dimension_semantics<parallel>, #tpu.dimension_semantics<arbitrary>], iteration_bounds = array<i64: 1, 1>, scalar_prefetch = 0 : i64, scratch_operands = 0 : i64, tpu.core_type = #tpu.core_type<tc>, window_params = [{transform_indices = @transform_0, window_bounds = array<i64: 4, 256>}, {transform_indices = @transform_1, window_bounds = array<i64: 1, 256>}]} {
    %c0_i32 = arith.constant 0 : i32
    %0 = arith.cmpi eq, %arg1, %c0_i32 : i32
    %1 = arith.extui %0 : i1 to i32
    %c0_i32_0 = arith.constant 0 : i32
    %2 = arith.cmpi ne, %1, %c0_i32_0 : i32
    scf.if %2 {
      %cst_7 = arith.constant 0.000000e+00 : f32
      %14 = vector.broadcast %cst_7 : f32 to vector<1x256xf32>
      %c0_8 = arith.constant 0 : index
      %c0_9 = arith.constant 0 : index
      %15 = vector.load %arg3[%c0_8, %c0_9] : memref<1x256xf32, #tpu.memory_space<vmem>>, vector<1x256xf32>
      tpu.vector_store %arg3[%c0_8, %c0_9], %14 {strides = array<i32>} : memref<1x256xf32, #tpu.memory_space<vmem>>, vector<1x256xf32>,
    } else {
    }
    %c0 = arith.constant 0 : index
    %c0_1 = arith.constant 0 : index
    %3 = vector.load %arg2[%c0, %c0_1] : memref<4x256xf32, #tpu.memory_space<vmem>>, vector<4x256xf32>
    %4 = arith.negf %3 : vector<4x256xf32>
    %5 = math.exp %4 : vector<4x256xf32>
    %cst = arith.constant 1.000000e+00 : f32
    %6 = vector.broadcast %cst : f32 to vector<4x256xf32>
    %7 = arith.addf %6, %5 : vector<4x256xf32>
    %8 = arith.divf %6, %7 : vector<4x256xf32>
    %c0_2 = arith.constant 0 : index
    %c0_3 = arith.constant 0 : index
    %9 = vector.load %arg3[%c0_2, %c0_3] : memref<1x256xf32, #tpu.memory_space<vmem>>, vector<1x256xf32>
    %cst_4 = arith.constant dense<0.000000e+00> : vector<256xf32>
    %10 = vector.multi_reduction <add>, %8, %cst_4 [0] : vector<4x256xf32> to vector<256xf32>
    %11 = vector.shape_cast %10 : vector<256xf32> to vector<1x256xf32>
    %12 = arith.addf %9, %11 : vector<1x256xf32>
    %c0_5 = arith.constant 0 : index
    %c0_6 = arith.constant 0 : index
    %13 = vector.load %arg3[%c0_5, %c0_6] : memref<1x256xf32, #tpu.memory_space<vmem>>, vector<1x256xf32>
    tpu.vector_store %arg3[%c0_5, %c0_6], %12 {strides = array<i32>} : memref<1x256xf32, #tpu.memory_space<vmem>>, vector<1x256xf32>,
    return
  }
  func.func @transform_0(%arg0: i32, %arg1: i32) -> (i32, i32) {
    %c0_i32 = arith.constant 0 : i32
    return %arg1, %arg0 : i32, i32
  }
  func.func @transform_1(%arg0: i32, %arg1: i32) -> (i32, i32) {
    %c0_i32 = arith.constant 0 : i32
    %c0_i32_0 = arith.constant 0 : i32
    return %c0_i32, %arg0 : i32, i32
  }
}

</mosaic_0001>

<bundles_post_ra>
// kernel: tpu_custom_call.1
= control target key start
LH: loop header
LB: loop body
LE: loop exit
PB: predicated region body
PF: predicated region fallthrough
CT: control target
= control target key end

     0   :  { %6 = vsyncpa [#allocation3], 0  ;;  %s190_s0 = inlined_call_operand.hbm [shape: f32[4,256], index: 0, kind: input, shape index: {}]   ;;  %s191_s1 = inlined_call_operand.hbm [shape: f32[1,256], index: 1, kind: output, shape index: {}]  }
   0x1   :  { %7 = vsyncpa [#allocation4], 0  ;;  %s13_s8 = sshll.u32 %s190_s0, 4  ;;  %s163_s9 = smov [#allocation2]   ;;  %s14_s8 = int_to_ptr.hbm [resolvable:$true] %s13_s8 }
   0x2   :  { %s15_s10 = sshll.u32 %s163_s9, 4  ;;  %s16_s10 = int_to_ptr.vmem [resolvable:$true] %s15_s10 }
   0x3   :  { %18 = dma.hbm_to_vmem [thread:$0]  %s14_s8, 128, %s16_s10, [#allocation3]  }
   0x4   :  { %159 = dma.done.wait [#allocation3], 128  }
   0x5   :  { %160 = vsyncadd [#allocation3], 4294967168  ;;  %v27_v0 = vlaneseq  ;;  %v32_v2 = vld [vmem:[#allocation2] sm:$0xff]  ;;  %v164_v3 = vmov 0.0   ;;  %vm59_vm5 = vcmask 1043456   ;;  %vm77_vm6 = vcmask 1040384  }
   0x6   :  { %v103_v4 = vmul.f32 -1.442695, %v32_v2  ;;  %s165_s0 = smov [#allocation5]   ;;  %s93_s14 = sshll.u32 %s191_s1, 4  ;;  %s94_s14 = int_to_ptr.hbm [resolvable:$true] %s93_s14 }
   0x7   :  { %vm179_vm0 = vcmp.lt.s32.totalorder %v27_v0, 256  ;;  %s91_s11 = sshll.u32 %s165_s0, 4  ;;  %s92_s11 = int_to_ptr.vmem [resolvable:$true] %s91_s11 }
   0x8   :  { %31 = vst.msk [vmem:[#allocation5] sm:$0x3] %vm179_vm0, %v164_v3  ;;  %107 = vpow2.f32 %v103_v4 }
   0xe   :  { %v108_v5 = vpop.eup %107 }
   0xf   :  { %v36_v6 = vadd.f32 1.0, %v108_v5  ;;  %v52_v32 = vld [vmem:[#allocation5] sm:$0x3] }
  0x11   :  { %109 = vrcp.f32 %v36_v6  ;;  %v48_v9 = vand.u32 2147483648, %v36_v6  ;;  %vm42_vm1 = vweird.f32 %v36_v6  ;;  %v46_v11 = vand.u32 2147483647, %v36_v6 }
  0x13   :  { %v49_v13 = vor.u32 1.1754944e-38, %v48_v9  ;;  %vm47_vm4 = vcmp.eq.f32.partialorder %v46_v11, 8.507059e+37 }
  0x17   :  { %v110_v7 = vpop.eup %109 }
  0x18   :  { %v38_v8 = vmul.f32 %v110_v7, %v36_v6  ;;  %vm43_vm2 = vweird.f32 %v110_v7 }
  0x19   :  { %vm44_vm3 = vmor %vm42_vm1, %vm43_vm2 }
  0x1a   :  { %v39_v10 = vsub.f32 1.0, %v38_v8 }
  0x1c   :  { %v40_v12 = vmul.f32 %v110_v7, %v39_v10 }
  0x1e   :  { %v41_v14 = vadd.f32 %v110_v7, %v40_v12 }
  0x20   :  { %v45_v15 = vsel %vm44_vm3, %v110_v7, %v41_v14 }
  0x21   :  { %v50_v16 = vsel %vm47_vm4, %v49_v13, %v45_v15 }
  0x22   :  { %54 = vst [vmem:[#allocation1] ss:$2 sm:$0xff] %v50_v16 }
  0x29   :  { %v55_v17 = vld.sshfl [vmem:[#allocation1] sm:$0xff pattern:$0x75316420]  ;;  %v56_v18 = vld.sshfl [vmem:[#allocation1 + $0x8] sm:$0xff pattern:$0x75316420] }
  0x2a   :  { %v60_v19 = vsel %vm59_vm5, %v55_v17, 0.0  ;;  %v67_v20 = vsel %vm59_vm5, %v56_v18, 0.0 }
  0x2b   :  { %v61_v21 = vrot.slane %v60_v19, 4  ;;  %v68_v22 = vrot.slane %v67_v20, 4 }
  0x2d   :  { %v62_v23 = vadd.f32 %v61_v21, %v60_v19  ;;  %v69_v24 = vadd.f32 %v68_v22, %v67_v20 }
  0x2f   :  { %v63_v25 = vrot.slane %v62_v23, 2  ;;  %v70_v26 = vrot.slane %v69_v24, 2 }
  0x31   :  { %v64_v27 = vadd.f32 %v63_v25, %v62_v23  ;;  %v71_v28 = vadd.f32 %v70_v26, %v69_v24 }
  0x33   :  { %v65_v29 = vrot.slane %v64_v27, 1  ;;  %v72_v30 = vrot.slane %v71_v28, 1 }
  0x35   :  { %v73_v31 = vadd.f32 %v72_v30, %v71_v28  ;;  %v66_v33 = vadd.f32 %v65_v29, %v64_v27 }
  0x37   :  { %v76_v34 = vrot.slane %v73_v31, 7 }
  0x39   :  { %v78_v35 = vsel %vm77_vm6, %v66_v33, %v76_v34 }
  0x3a   :  { %v80_v36 = vadd.f32 %v78_v35, %v52_v32 }
  0x3c   :  { %85 = vst.msk [vmem:[#allocation5] sm:$0x3] %vm179_vm0, %v80_v36 }
  0x3d   :  { %96 = dma.vmem_to_hbm [thread:$0]  %s92_s11, 32, %s94_s14, [#allocation4]  }
  0x3e   :  { %161 = dma.done.wait [#allocation4], 32  }
  0x3f   :  { %162 = vsyncadd [#allocation4], 4294967264 }
  0x40   :  { %101 = vsyncpa [#allocation3], 1 }
  0x41   :  { %102 = vsyncpa [#allocation4], 1 }

</bundles_post_ra>
